<compile_context>
chip_gen: v7x
topology: tpu7x:2x2x1
jax: 0.10.0
libtpu: 0.0.40
codegen_flags: <defaults>
</compile_context>

<pallas_src>
import functools

import jax
import jax.numpy as jnp
from jax.experimental import pallas as pl
from jax.experimental.pallas import tpu as pltpu


def _pinn_kernel(xT_ref, w1t_ref, b1t_ref, w2t_ref, b2t_ref, w3_ref, b3_ref,
                 o_ref, *, mm_dtype):
    # All tensors are "batch-on-lanes": (features, batch_tile).
    xT = xT_ref[...].astype(mm_dtype)                 # (d,  tile)
    w1t = w1t_ref[...].astype(mm_dtype)               # (h,  d)
    w2t = w2t_ref[...].astype(mm_dtype)               # (h,  h)

    # Layer 1: (h, d) @ (d, tile) -> (h, tile), f32 accumulation on the MXU.
    h1 = jnp.tanh(
        jnp.dot(w1t, xT, preferred_element_type=jnp.float32) + b1t_ref[...]
    )
    # Layer 2: (h, h) @ (h, tile) -> (h, tile).
    h2 = jnp.tanh(
        jnp.dot(w2t, h1.astype(mm_dtype), preferred_element_type=jnp.float32)
        + b2t_ref[...]
    )
    # Layer 3 (64 -> 1): VPU multiply + sublane reduce (no 1-column MXU pass).
    # w3_ref is (h, 1) and broadcasts over the lane axis.
    o_ref[...] = (
        jnp.sum(h2 * w3_ref[...], axis=0, keepdims=True) + b3_ref[...]
    )                                                  # (1, tile), lane-dense


def pinn_forward(x, params, *, tile_n=1024, use_bf16=False):
    """Fused PINN forward pass.

    x:      (N, input_dim) float32
    params: dict with w1 (D,64), b1 (1,64), w2 (64,64), b2 (1,64),
            w3 (64,1), b3 (1,1)   (i.e. (in_features, out_features) layout)
    Returns (N, 1) float32.
    """
    n, d = x.shape
    w1, b1 = params["w1"], params["b1"]
    w2, b2 = params["w2"], params["b2"]
    w3, b3 = params["w3"], params["b3"]
    h = w1.shape[1]

    # --- batch-on-lanes layout: transpose once in the wrapper -------------
    x_t = x.T                                  # (d, n)
    w1t = w1.T                                 # (h, d)
    w2t = w2.T                                 # (h, h)
    b1t = b1.reshape(h, 1)
    b2t = b2.reshape(h, 1)
    w3c = w3.reshape(h, 1)
    b3c = b3.reshape(1, 1)

    # --- tiling: whole batch in one step if it fits, else pad to tile_n ---
    if n <= tile_n:
        tile = n
        n_pad = n
    else:
        tile = tile_n
        n_pad = -(-n // tile) * tile           # ceil to a tile multiple
        if n_pad != n:
            x_t = jnp.pad(x_t, ((0, 0), (0, n_pad - n)))

    grid = (n_pad // tile,)
    mm_dtype = jnp.bfloat16 if use_bf16 else jnp.float32
    kernel = functools.partial(_pinn_kernel, mm_dtype=mm_dtype)

    rep = lambda shape: pl.BlockSpec(shape, lambda i: (0, 0))  # replicated

    out = pl.pallas_call(
        kernel,
        out_shape=jax.ShapeDtypeStruct((1, n_pad), jnp.float32),
        grid_spec=pltpu.PrefetchScalarGridSpec(
            num_scalar_prefetch=0,
            grid=grid,
            in_specs=[
                pl.BlockSpec((d, tile), lambda i: (0, i)),  # x^T tile
                rep((h, d)),    # w1^T
                rep((h, 1)),    # b1
                rep((h, h)),    # w2^T
                rep((h, 1)),    # b2
                rep((h, 1)),    # w3 (column)
                rep((1, 1)),    # b3
            ],
            out_specs=pl.BlockSpec((1, tile), lambda i: (0, i)),
        ),
        compiler_params=pltpu.CompilerParams(
            dimension_semantics=("parallel",),
        ),
    )(x_t, w1t, b1t, w2t, b2t, w3c, b3c)

    return out[0, :n].reshape(n, 1)


def init_params(key, input_dim=5, hidden=64):
    """Deterministic init mimicking PyTorch nn.Linear default U(-1/sqrt(fan_in), +)."""
    ks = jax.random.split(key, 6)

    def lin(kw, kb, fan_in, fan_out):
        bound = 1.0 / jnp.sqrt(jnp.asarray(fan_in, jnp.float32))
        w = jax.random.uniform(kw, (fan_in, fan_out), jnp.float32, -bound, bound)
        b = jax.random.uniform(kb, (1, fan_out), jnp.float32, -bound, bound)
        return w, b

    w1, b1 = lin(ks[0], ks[1], input_dim, hidden)
    w2, b2 = lin(ks[2], ks[3], hidden, hidden)
    w3, b3 = lin(ks[4], ks[5], hidden, 1)
    return dict(w1=w1, b1=b1, w2=w2, b2=b2, w3=w3, b3=b3)


def pinn_reference(x, p):
    h = jnp.tanh(x @ p["w1"] + p["b1"])
    h = jnp.tanh(h @ p["w2"] + p["b2"])
    return h @ p["w3"] + p["b3"]


if __name__ == "__main__":
    key = jax.random.PRNGKey(0)
    kx1, kx2, kp = jax.random.split(key, 3)

    INPUT_DIM, HIDDEN = 5, 64
    params = init_params(kp, input_dim=INPUT_DIM, hidden=HIDDEN)

    # Case 1: small batch -> single-block path (no tiling, one grid step).
    N1 = 64
    x1 = jax.random.normal(kx1, (N1, INPUT_DIM), jnp.float32)
    out1 = jax.block_until_ready(pinn_forward(x1, params))
    ref1 = pinn_reference(x1, params)
    assert out1.shape == (N1, 1), out1.shape
    assert jnp.allclose(out1, ref1, atol=1e-5, rtol=1e-5), "mismatch (small batch)"

    # Case 2: batch not a tile multiple -> padded, multi-step lane-dense path.
    N2, TILE = 320, 128
    x2 = jax.random.normal(kx2, (N2, INPUT_DIM), jnp.float32)
    out2 = jax.block_until_ready(pinn_forward(x2, params, tile_n=TILE))
    ref2 = pinn_reference(x2, params)
    assert out2.shape == (N2, 1), out2.shape
    assert jnp.allclose(out2, ref2, atol=1e-5, rtol=1e-5), "mismatch (tiled batch)"

    print("KERNEL_OK")
</pallas_src>

<mosaic_0001>
module attributes {stable_mosaic.version = 11 : i64} {
  func.func @_pinn_kernel(%arg0: i32, %arg1: memref<5x64xf32, #tpu.memory_space<vmem>>, %arg2: memref<64x5xf32, #tpu.memory_space<vmem>>, %arg3: memref<64x1xf32, #tpu.memory_space<vmem>>, %arg4: memref<64x64xf32, #tpu.memory_space<vmem>>, %arg5: memref<64x1xf32, #tpu.memory_space<vmem>>, %arg6: memref<64x1xf32, #tpu.memory_space<vmem>>, %arg7: memref<1x1xf32, #tpu.memory_space<vmem>>, %arg8: memref<1x64xf32, #tpu.memory_space<vmem>>) attributes {dimension_semantics = [#tpu.dimension_semantics<parallel>], iteration_bounds = array<i64: 1>, scalar_prefetch = 0 : i64, scratch_operands = 0 : i64, tpu.core_type = #tpu.core_type<tc>, window_params = [{transform_indices = @transform_0, window_bounds = array<i64: 5, 64>}, {pipeline_mode = #tpu.pipeline_mode<synchronous>, transform_indices = @transform_1, window_bounds = array<i64: 64, 5>}, {pipeline_mode = #tpu.pipeline_mode<synchronous>, transform_indices = @transform_2, window_bounds = array<i64: 64, 1>}, {pipeline_mode = #tpu.pipeline_mode<synchronous>, transform_indices = @transform_3, window_bounds = array<i64: 64, 64>}, {pipeline_mode = #tpu.pipeline_mode<synchronous>, transform_indices = @transform_4, window_bounds = array<i64: 64, 1>}, {pipeline_mode = #tpu.pipeline_mode<synchronous>, transform_indices = @transform_5, window_bounds = array<i64: 64, 1>}, {pipeline_mode = #tpu.pipeline_mode<synchronous>, transform_indices = @transform_6, window_bounds = array<i64: 1, 1>}, {transform_indices = @transform_7, window_bounds = array<i64: 1, 64>}]} {
    %c0 = arith.constant 0 : index
    %c0_0 = arith.constant 0 : index
    %0 = vector.load %arg1[%c0, %c0_0] : memref<5x64xf32, #tpu.memory_space<vmem>>, vector<5x64xf32>
    %c0_1 = arith.constant 0 : index
    %c0_2 = arith.constant 0 : index
    %1 = vector.load %arg2[%c0_1, %c0_2] : memref<64x5xf32, #tpu.memory_space<vmem>>, vector<64x5xf32>
    %c0_3 = arith.constant 0 : index
    %c0_4 = arith.constant 0 : index
    %2 = vector.load %arg4[%c0_3, %c0_4] : memref<64x64xf32, #tpu.memory_space<vmem>>, vector<64x64xf32>
    %cst = arith.constant dense<0.000000e+00> : vector<64x64xf32>
    %3 = tpu.matmul %1, %0, %cst {dimension_numbers = #tpu.dot_dimension_numbers<[1], [0], [0], [1], [0, 0, 1, 1], [], []>} : vector<64x5xf32>, vector<5x64xf32>, vector<64x64xf32> -> vector<64x64xf32>
    %c0_5 = arith.constant 0 : index
    %c0_6 = arith.constant 0 : index
    %4 = vector.load %arg3[%c0_5, %c0_6] : memref<64x1xf32, #tpu.memory_space<vmem>>, vector<64x1xf32>
    %5 = vector.broadcast %4 : vector<64x1xf32> to vector<64x64xf32>
    %6 = arith.addf %3, %5 : vector<64x64xf32>
    %7 = math.tanh %6 : vector<64x64xf32>
    %cst_7 = arith.constant dense<0.000000e+00> : vector<64x64xf32>
    %8 = tpu.matmul %2, %7, %cst_7 {dimension_numbers = #tpu.dot_dimension_numbers<[1], [0], [0], [1], [0, 0, 1, 1], [], []>} : vector<64x64xf32>, vector<64x64xf32>, vector<64x64xf32> -> vector<64x64xf32>
    %c0_8 = arith.constant 0 : index
    %c0_9 = arith.constant 0 : index
    %9 = vector.load %arg5[%c0_8, %c0_9] : memref<64x1xf32, #tpu.memory_space<vmem>>, vector<64x1xf32>
    %10 = vector.broadcast %9 : vector<64x1xf32> to vector<64x64xf32>
    %11 = arith.addf %8, %10 : vector<64x64xf32>
    %12 = math.tanh %11 : vector<64x64xf32>
    %c0_10 = arith.constant 0 : index
    %c0_11 = arith.constant 0 : index
    %13 = vector.load %arg6[%c0_10, %c0_11] : memref<64x1xf32, #tpu.memory_space<vmem>>, vector<64x1xf32>
    %14 = vector.broadcast %13 : vector<64x1xf32> to vector<64x64xf32>
    %15 = arith.mulf %12, %14 : vector<64x64xf32>
    %cst_12 = arith.constant dense<0.000000e+00> : vector<64xf32>
    %16 = vector.multi_reduction <add>, %15, %cst_12 [0] : vector<64x64xf32> to vector<64xf32>
    %17 = vector.shape_cast %16 : vector<64xf32> to vector<1x64xf32>
    %c0_13 = arith.constant 0 : index
    %c0_14 = arith.constant 0 : index
    %18 = vector.load %arg7[%c0_13, %c0_14] : memref<1x1xf32, #tpu.memory_space<vmem>>, vector<1x1xf32>
    %19 = vector.broadcast %18 : vector<1x1xf32> to vector<1x64xf32>
    %20 = arith.addf %17, %19 : vector<1x64xf32>
    %c0_15 = arith.constant 0 : index
    %c0_16 = arith.constant 0 : index
    %21 = vector.load %arg8[%c0_15, %c0_16] : memref<1x64xf32, #tpu.memory_space<vmem>>, vector<1x64xf32>
    tpu.vector_store %arg8[%c0_15, %c0_16], %20 {strides = array<i32>} : memref<1x64xf32, #tpu.memory_space<vmem>>, vector<1x64xf32>,
    return
  }
  func.func @transform_0(%arg0: i32) -> (i32, i32) {
    %c0_i32 = arith.constant 0 : i32
    %c0_i32_0 = arith.constant 0 : i32
    return %c0_i32, %arg0 : i32, i32
  }
  func.func @transform_1(%arg0: i32) -> (i32, i32) {
    %c0_i32 = arith.constant 0 : i32
    %c0_i32_0 = arith.constant 0 : i32
    %c0_i32_1 = arith.constant 0 : i32
    return %c0_i32, %c0_i32_0 : i32, i32
  }
  func.func @transform_2(%arg0: i32) -> (i32, i32) {
    %c0_i32 = arith.constant 0 : i32
    %c0_i32_0 = arith.constant 0 : i32
    %c0_i32_1 = arith.constant 0 : i32
    return %c0_i32, %c0_i32_0 : i32, i32
  }
  func.func @transform_3(%arg0: i32) -> (i32, i32) {
    %c0_i32 = arith.constant 0 : i32
    %c0_i32_0 = arith.constant 0 : i32
    %c0_i32_1 = arith.constant 0 : i32
    return %c0_i32, %c0_i32_0 : i32, i32
  }
  func.func @transform_4(%arg0: i32) -> (i32, i32) {
    %c0_i32 = arith.constant 0 : i32
    %c0_i32_0 = arith.constant 0 : i32
    %c0_i32_1 = arith.constant 0 : i32
    return %c0_i32, %c0_i32_0 : i32, i32
  }
  func.func @transform_5(%arg0: i32) -> (i32, i32) {
    %c0_i32 = arith.constant 0 : i32
    %c0_i32_0 = arith.constant 0 : i32
    %c0_i32_1 = arith.constant 0 : i32
    return %c0_i32, %c0_i32_0 : i32, i32
  }
  func.func @transform_6(%arg0: i32) -> (i32, i32) {
    %c0_i32 = arith.constant 0 : i32
    %c0_i32_0 = arith.constant 0 : i32
    %c0_i32_1 = arith.constant 0 : i32
    return %c0_i32, %c0_i32_0 : i32, i32
  }
  func.func @transform_7(%arg0: i32) -> (i32, i32) {
    %c0_i32 = arith.constant 0 : i32
    %c0_i32_0 = arith.constant 0 : i32
    return %c0_i32, %arg0 : i32, i32
  }
}

</mosaic_0001>

<bundles_post_ra>
// kernel: tpu_custom_call.1
= control target key start
LH: loop header
LB: loop body
LE: loop exit
PB: predicated region body
PF: predicated region fallthrough
CT: control target
= control target key end

     0   :  { %s898_s0 = inlined_call_operand.vmem [shape: f32[5,64], index: 0, kind: input, shape index: {}]   ;;  %s899_s1 = inlined_call_operand.vmem [shape: f32[64,5], index: 1, kind: input, shape index: {}]   ;;  %s900_s2 = inlined_call_operand.vmem [shape: f32[64,1], index: 2, kind: input, shape index: {}]   ;;  %s901_s3 = inlined_call_operand.vmem [shape: f32[64,64], index: 3, kind: input, shape index: {}]   ;;  %s902_s4 = inlined_call_operand.vmem [shape: f32[64,1], index: 4, kind: input, shape index: {}]   ;;  %s903_s5 = inlined_call_operand.vmem [shape: f32[64,1], index: 5, kind: input, shape index: {}]   ;;  %s904_s6 = inlined_call_operand.<no memory space> [shape: f32[1,1], index: 6, kind: input, shape index: {}]   ;;  %s905_s7 = inlined_call_operand.hbm [shape: f32[1,64], index: 7, kind: output, shape index: {}]  }
   0x1   :  { %v12_v0 = vstv %s904_s6 }
   0x2   :  { %13 = vst [vmem:[#allocation2] sm:$0x1] %v12_v0 }
   0x3   :  { %v29_v1 = vld [vmem:[%s898_s0] sm:$0x1f]  ;;  %vm119_vm0 = vcmask 1044480   ;;  %vm94_vm1 = vcmask 39936   ;;  %v31_v3 = vld [vmem:[%s899_s1 + $0x8] sm:$0xff]  ;;  %v32_v4 = vld [vmem:[%s899_s1 + $0x10] sm:$0xff] }
   0x4   :  { %v30_v2 = vld [vmem:[%s899_s1] sm:$0xff]  ;;  %568 = vmatprep.subr.msk.mxu0 %vm119_vm0, %v29_v1  ;;  %v694_v5 = vmov 0   ;;  %v48_v7 = vld [vmem:[%s900_s2 + $0x10] sm:$0xff]  ;;  %v33_v8 = vld [vmem:[%s899_s1 + $0x18] sm:$0xff] }
   0x5   :  { %570 = vmatprep.mubr.msk.f32.mxu0 %vm94_vm1, %v30_v2  ;;  %569 = vmatpush3.msk.msra.mxu0 %vm119_vm0, %v29_v1  ;;  %v46_v6 = vld [vmem:[%s900_s2] sm:$0xff]  ;;  %v47_v10 = vld [vmem:[%s900_s2 + $0x8] sm:$0xff]  ;;  %v49_v11 = vld [vmem:[%s900_s2 + $0x18] sm:$0xff] }
   0x6   :  { %636 = vset.pattern.permute.xlu0 %v694_v5  ;;  %571 = vmatmul.mubr.msk.f32.vlgmr.msra.gmra.mrb[0].mxu0 %vm94_vm1, %v31_v3  ;;  %v34_v9 = vld [vmem:[%s899_s1 + $0x20] sm:$0xff]  ;;  %v35_v12 = vld [vmem:[%s899_s1 + $0x28] sm:$0xff]  ;;  %v36_v13 = vld [vmem:[%s899_s1 + $0x30] sm:$0xff] }
   0x7   :  { %637 = vset.pattern.permute.xlu1 %v694_v5  ;;  %573 = vmatprep.mubr.msk.f32.mxu0 %vm94_vm1, %v32_v4  ;;  %v50_v14 = vld [vmem:[%s900_s2 + $0x20] sm:$0xff]  ;;  %v51_v15 = vld [vmem:[%s900_s2 + $0x28] sm:$0xff] }
   0x8   :  { %56 = vperm.xlu0 %636, %v46_v6   ;;  %66 = vperm.xlu1 %637, %v48_v7  }
   0xa   :  { %574 = vmatmul.mubr.msk.f32.gmra.mrb[2].mxu0 %vm94_vm1, %v33_v8 }
   0xb   :  { %576 = vmatprep.mubr.msk.f32.mxu0 %vm94_vm1, %v34_v9 }
   0xc   :  { %61 = vperm.xlu0 %636, %v47_v10   ;;  %71 = vperm.xlu1 %637, %v49_v11  }
   0xe   :  { %577 = vmatmul.mubr.msk.f32.gmra.mrb[4].mxu0 %vm94_vm1, %v35_v12 }
   0xf   :  { %14 = vsyncpa [#allocation4], 0  ;;  %579 = vmatprep.mubr.msk.f32.mxu0 %vm94_vm1, %v36_v13  ;;  %v37_v16 = vld [vmem:[%s899_s1 + $0x38] sm:$0xff]  ;;  %v52_v17 = vld [vmem:[%s900_s2 + $0x30] sm:$0xff]  ;;  %vm284_vm2 = vcmask 523264   ;;  %vm510_vm3 = vcmask 516096  }
  0x10   :  { %76 = vperm.xlu0 %636, %v50_v14   ;;  %81 = vperm.xlu1 %637, %v51_v15   ;;  %v53_v18 = vld [vmem:[%s900_s2 + $0x38] sm:$0xff]  ;;  %v236_v19 = vld [vmem:[%s902_s4] sm:$0xff]  ;;  %v237_v20 = vld [vmem:[%s902_s4 + $0x8] sm:$0xff] }
  0x11   :  { %v238_v21 = vld [vmem:[%s902_s4 + $0x10] sm:$0xff]  ;;  %v239_v22 = vld [vmem:[%s902_s4 + $0x18] sm:$0xff]  ;;  %v240_v23 = vld [vmem:[%s902_s4 + $0x20] sm:$0xff] }
  0x12   :  { %580 = vmatmul.mubr.msk.f32.gmra.mrb[6].mxu0 %vm94_vm1, %v37_v16  ;;  %v241_v24 = vld [vmem:[%s902_s4 + $0x28] sm:$0xff]  ;;  %v242_v25 = vld [vmem:[%s902_s4 + $0x30] sm:$0xff]  ;;  %v243_v26 = vld [vmem:[%s902_s4 + $0x38] sm:$0xff] }
  0x13   :  { %v422_v27 = vld [vmem:[%s903_s5] sm:$0xff]  ;;  %v423_v28 = vld [vmem:[%s903_s5 + $0x8] sm:$0xff]  ;;  %v424_v29 = vld [vmem:[%s903_s5 + $0x10] sm:$0xff] }
  0x14   :  { %86 = vperm.xlu0 %636, %v52_v17   ;;  %91 = vperm.xlu1 %637, %v53_v18   ;;  %v425_v30 = vld [vmem:[%s903_s5 + $0x18] sm:$0xff]  ;;  %v426_v31 = vld [vmem:[%s903_s5 + $0x20] sm:$0xff]  ;;  %v427_v32 = vld [vmem:[%s903_s5 + $0x28] sm:$0xff] }
  0x15   :  { %v428_v33 = vld [vmem:[%s903_s5 + $0x30] sm:$0xff]  ;;  %v429_v34 = vld [vmem:[%s903_s5 + $0x38] sm:$0xff]  ;;  %v499_v35 = vld [vmem:[#allocation2] sm:$0x1] }
  0x16   :  { %v38_v36 = vld [vmem:[%s901_s3] sm:$0xff]  ;;  %v40_v37 = vld [vmem:[%s901_s3 + $0x10] sm:$0xff]  ;;  %v39_v10 = vld [vmem:[%s901_s3 + $0x8] sm:$0xff] }
  0x17   :  { %598 = vmatprep.mubr.msk.f32.mxu0 %vm284_vm2, %v38_v36  ;;  %601 = vmatprep.mubr.msk.f32.mxu1 %vm284_vm2, %v40_v37  ;;  %v41_v11 = vld [vmem:[%s901_s3 + $0x18] sm:$0xff]  ;;  %v42_v12 = vld [vmem:[%s901_s3 + $0x20] sm:$0xff]  ;;  %v43_v13 = vld [vmem:[%s901_s3 + $0x28] sm:$0xff] }
  0x18   :  { %246 = vperm.xlu0 %636, %v236_v19   ;;  %251 = vperm.xlu1 %637, %v237_v20   ;;  %v44_v14 = vld [vmem:[%s901_s3 + $0x30] sm:$0xff]  ;;  %v45_v15 = vld [vmem:[%s901_s3 + $0x38] sm:$0xff]  ;;  %s695_s3 = smov [#allocation3]  }
  0x19   :  { %s518_s27 = sshll.u32 %s695_s3, 4  ;;  %s519_s27 = int_to_ptr.vmem [resolvable:$true] %s518_s27 }
  0x1a   :  { %s670_s28 = scalar_lea.vmem %s519_s27, 16  ;;  %s674_s29 = scalar_lea.vmem %s519_s27, 32 }
  0x1b   :  { %p671_p0 = scmp.ne.s32.totalorder %s519_s27, %s670_s28  ;;  %p675_p1 = scmp.lt.s32.totalorder %s519_s27, %s519_s27 }
  0x1c   :  { %256 = vperm.xlu0 %636, %v238_v21   ;;  %261 = vperm.xlu1 %637, %v239_v22   ;;  %p676_p2 = scmp.lt.s32.totalorder %s674_s29, %s670_s28 }
  0x1e   :  { %p677_p3 = por %p676_p2, %p675_p1 }
  0x20   :  { %266 = vperm.xlu0 %636, %v240_v23   ;;  %271 = vperm.xlu1 %637, %v241_v24   ;;  %p678_p4 = pnand %p677_p3, %p671_p0 }
  0x24   :  { %276 = vperm.xlu0 %636, %v242_v25   ;;  %281 = vperm.xlu1 %637, %v243_v26  }
  0x28   :  { %432 = vperm.xlu0 %636, %v422_v27   ;;  %437 = vperm.xlu1 %637, %v423_v28  }
  0x2c   :  { %442 = vperm.xlu0 %636, %v424_v29   ;;  %447 = vperm.xlu1 %637, %v425_v30  }
  0x30   :  { %452 = vperm.xlu0 %636, %v426_v31   ;;  %457 = vperm.xlu1 %637, %v427_v32  }
  0x34   :  { %462 = vperm.xlu0 %636, %v428_v33   ;;  %467 = vperm.xlu1 %637, %v429_v34  }
  0x38   :  { %502 = vperm.xlu0 %636, %v499_v35  }
  0x87   :  { %v57_v38 = vpop.permute.xlu0 %56  ;;  %v67_v39 = vpop.permute.xlu1 %66 }
  0x8b   :  { %v62_v40 = vpop.permute.xlu0 %61  ;;  %v72_v41 = vpop.permute.xlu1 %71 }
  0x8f   :  { %v82_v49 = vpop.permute.xlu1 %81  ;;  %v77_v51 = vpop.permute.xlu0 %76 }
  0x93   :  { %v92_v56 = vpop.permute.xlu1 %91  ;;  %v87_v59 = vpop.permute.xlu0 %86 }
  0x97   :  { %v247_v16 = vpop.permute.xlu0 %246  ;;  %v252_v17 = vpop.permute.xlu1 %251 }
  0x9b   :  { %v257_v18 = vpop.permute.xlu0 %256  ;;  %v262_v19 = vpop.permute.xlu1 %261 }
  0x9f   :  { %v267_v20 = vpop.permute.xlu0 %266  ;;  %v272_v21 = vpop.permute.xlu1 %271 }
  0xa3   :  { %v277_v22 = vpop.permute.xlu0 %276  ;;  %v282_v23 = vpop.permute.xlu1 %281 }
  0xa7   :  { %v433_v33 = vpop.permute.xlu0 %432  ;;  %v438_v37 = vpop.permute.xlu1 %437 }
  0xd9   :  { %v572_v42 = vpop.f32.mrb[0].mxu0 }
  0xda   :  { %v195_v43 = vadd.f32 %v572_v42, %v62_v40  ;;  %v189_v44 = vpop.f32.mrb[1].mxu0  ;;  %v443_v42 = vpop.permute.xlu0 %442 }
  0xdb   :  { %v190_v45 = vadd.f32 %v189_v44, %v57_v38  ;;  %v448_v44 = vpop.permute.xlu1 %447 }
  0xdc   :  { %638 = vtanh.f32 %v195_v43 }
  0xdd   :  { %640 = vtanh.f32 %v190_v45  ;;  %v575_v46 = vpop.f32.mrb[2].mxu0 }
  0xde   :  { %v205_v47 = vadd.f32 %v575_v46, %v72_v41  ;;  %v199_v48 = vpop.f32.mrb[3].mxu0 }
  0xdf   :  { %v200_v50 = vadd.f32 %v199_v48, %v67_v39 }
  0xe0   :  { %642 = vtanh.f32 %v205_v47 }
  0xe1   :  { %644 = vtanh.f32 %v200_v50  ;;  %v578_v52 = vpop.f32.mrb[4].mxu0 }
  0xe2   :  { %v215_v53 = vadd.f32 %v578_v52, %v82_v49  ;;  %v209_v54 = vpop.f32.mrb[5].mxu0 }
  0xe3   :  { %v210_v55 = vadd.f32 %v209_v54, %v77_v51  ;;  %v453_v51 = vpop.permute.xlu0 %452 }
  0xe4   :  { %646 = vtanh.f32 %v215_v53 }
  0xe5   :  { %648 = vtanh.f32 %v210_v55  ;;  %v581_v57 = vpop.f32.mrb[6].mxu0 }
  0xe6   :  { %v639_v58 = vpop.eup %638  ;;  %v225_v60 = vadd.f32 %v581_v57, %v92_v56  ;;  %v219_v61 = vpop.f32.mrb[7].mxu0 }
  0xe7   :  { %v641_v62 = vpop.eup %640  ;;  %v220_v63 = vadd.f32 %v219_v61, %v87_v59  ;;  %v458_v57 = vpop.permute.xlu1 %457 }
  0xe8   :  { %650 = vtanh.f32 %v225_v60  ;;  %v610_v0 = vpack.c.bf16 %v639_v58, %v641_v62 }
  0xe9   :  { %652 = vtanh.f32 %v220_v63 }
  0xea   :  { %v643_v1 = vpop.eup %642  ;;  %611 = vmatprep.subr.bf16.mxu0 %v610_v0  ;;  %626 = vmatprep.subr.bf16.mxu1 %v610_v0 }
  0xeb   :  { %v645_v2 = vpop.eup %644  ;;  %613 = vmatpush3.bf16.msra.mxu0 %v610_v0  ;;  %630 = vmatpush3.bf16.msra.mxu1 %v610_v0 }
  0xec   :  { %v614_v3 = vpack.c.bf16 %v643_v1, %v645_v2  ;;  %v463_v2 = vpop.permute.xlu0 %462 }
  0xee   :  { %v647_v4 = vpop.eup %646  ;;  %615 = vmatprep.subr.bf16.mxu0 %v614_v3  ;;  %627 = vmatprep.subr.bf16.mxu1 %v614_v3 }
  0xef   :  { %v649_v5 = vpop.eup %648  ;;  %617 = vmatpush3.bf16.msra.mxu0 %v614_v3  ;;  %631 = vmatpush3.bf16.msra.mxu1 %v614_v3 }
  0xf0   :  { %v618_v6 = vpack.c.bf16 %v647_v4, %v649_v5 }
  0xf2   :  { %v651_v7 = vpop.eup %650  ;;  %619 = vmatprep.subr.bf16.mxu0 %v618_v6  ;;  %628 = vmatprep.subr.bf16.mxu1 %v618_v6 }
  0xf3   :  { %v653_v8 = vpop.eup %652  ;;  %621 = vmatpush3.bf16.msra.mxu0 %v618_v6  ;;  %632 = vmatpush3.bf16.msra.mxu1 %v618_v6  ;;  %v468_v6 = vpop.permute.xlu1 %467 }
  0xf4   :  { %v622_v9 = vpack.c.bf16 %v651_v7, %v653_v8 }
  0xf6   :  { %623 = vmatprep.subr.bf16.mxu0 %v622_v9  ;;  %629 = vmatprep.subr.bf16.mxu1 %v622_v9 }
  0xf7   :  { %625 = vmatpush3.bf16.msra.mxu0 %v622_v9  ;;  %633 = vmatpush3.bf16.msra.mxu1 %v622_v9 }
  0xfa   :  { %599 = vmatmul.mubr.msk.f32.vlgmr.msra.gmra.mrb[8].mxu0 %vm284_vm2, %v39_v10  ;;  %602 = vmatmul.mubr.msk.f32.vlgmr.msra.gmra.mrb[0].mxu1 %vm284_vm2, %v41_v11 }
  0xfb   :  { %604 = vmatprep.mubr.msk.f32.mxu1 %vm284_vm2, %v42_v12 }
  0xfe   :  { %605 = vmatmul.mubr.msk.f32.gmra.mrb[2].mxu1 %vm284_vm2, %v43_v13 }
  0xff   :  { %607 = vmatprep.mubr.msk.f32.mxu1 %vm284_vm2, %v44_v14  ;;  %v505_v14 = vlaneseq }
 0x102   :  { %608 = vmatmul.mubr.msk.f32.gmra.mrb[4].mxu1 %vm284_vm2, %v45_v15 }
 0x1cd   :  { %v600_v24 = vpop.f32.mrb[8].mxu0  ;;  %v603_v25 = vpop.f32.mrb[0].mxu1 }
 0x1ce   :  { %v381_v26 = vadd.f32 %v600_v24, %v252_v17  ;;  %v391_v27 = vadd.f32 %v603_v25, %v262_v19  ;;  %v375_v28 = vpop.f32.mrb[9].mxu0  ;;  %v385_v29 = vpop.f32.mrb[1].mxu1  ;;  %v506_v17 = vshrl.u32 %v505_v14, 7 }
 0x1cf   :  { %v376_v30 = vadd.f32 %v375_v28, %v247_v16  ;;  %v386_v31 = vadd.f32 %v385_v29, %v257_v18 }
 0x1d0   :  { %654 = vtanh.f32 %v381_v26 }
 0x1d1   :  { %656 = vtanh.f32 %v391_v27  ;;  %v606_v32 = vpop.f32.mrb[2].mxu1 }
 0x1d2   :  { %658 = vtanh.f32 %v376_v30  ;;  %v401_v34 = vadd.f32 %v606_v32, %v272_v21  ;;  %v395_v35 = vpop.f32.mrb[3].mxu1 }
 0x1d3   :  { %660 = vtanh.f32 %v386_v31  ;;  %v396_v36 = vadd.f32 %v395_v35, %v267_v20  ;;  %v507_v20 = vsub.s32 0, %v506_v17 }
 0x1d5   :  { %662 = vtanh.f32 %v396_v36  ;;  %v609_v38 = vpop.f32.mrb[4].mxu1 }
 0x1d6   :  { %664 = vtanh.f32 %v401_v34  ;;  %v411_v39 = vadd.f32 %v609_v38, %v282_v23  ;;  %v405_v40 = vpop.f32.mrb[5].mxu1 }
 0x1d7   :  { %v406_v41 = vadd.f32 %v405_v40, %v277_v22  ;;  %v503_v22 = vpop.permute.xlu0 %502 }
 0x1d8   :  { %v508_v24 = vrot.slane %v503_v22, %v507_v20 }
 0x1d9   :  { %666 = vtanh.f32 %v406_v41 }
 0x1da   :  { %v655_v43 = vpop.eup %654  ;;  %668 = vtanh.f32 %v411_v39 }
 0x1db   :  { %v657_v45 = vpop.eup %656  ;;  %v471_v46 = vmul.f32 %v655_v43, %v438_v37 }
 0x1dc   :  { %v659_v47 = vpop.eup %658  ;;  %v473_v54 = vmul.f32 %v657_v45, %v448_v44 }
 0x1dd   :  { %v661_v48 = vpop.eup %660  ;;  %v479_v49 = vsel %vm284_vm2, %v471_v46, 0.0  ;;  %v470_v50 = vmul.f32 %v659_v47, %v433_v33 }
 0x1de   :  { %v472_v52 = vmul.f32 %v661_v48, %v443_v42  ;;  %v483_v63 = vsel %vm284_vm2, %v473_v54, 0.0 }
 0x1df   :  { %v663_v53 = vpop.eup %662  ;;  %v478_v55 = vsel %vm284_vm2, %v470_v50, 0.0 }
 0x1e0   :  { %v665_v56 = vpop.eup %664  ;;  %v480_v58 = vadd.f32 %v479_v49, %v478_v55  ;;  %v481_v59 = vsel %vm284_vm2, %v472_v52, 0.0  ;;  %v474_v60 = vmul.f32 %v663_v53, %v453_v51 }
 0x1e1   :  { %v475_v0 = vmul.f32 %v665_v56, %v458_v57 }
 0x1e2   :  { %v482_v61 = vadd.f32 %v481_v59, %v480_v58  ;;  %v485_v4 = vsel %vm284_vm2, %v474_v60, 0.0 }
 0x1e3   :  { %v667_v62 = vpop.eup %666  ;;  %v487_v8 = vsel %vm284_vm2, %v475_v0, 0.0 }
 0x1e4   :  { %v669_v1 = vpop.eup %668  ;;  %v484_v3 = vadd.f32 %v483_v63, %v482_v61  ;;  %v476_v5 = vmul.f32 %v667_v62, %v463_v2 }
 0x1e5   :  { %v477_v9 = vmul.f32 %v669_v1, %v468_v6 }
 0x1e6   :  { %v486_v7 = vadd.f32 %v485_v4, %v484_v3  ;;  %v489_v11 = vsel %vm284_vm2, %v476_v5, 0.0 }
 0x1e7   :  { %v491_v13 = vsel %vm284_vm2, %v477_v9, 0.0 }
 0x1e8   :  { %v488_v10 = vadd.f32 %v487_v8, %v486_v7 }
 0x1ea   :  { %v490_v12 = vadd.f32 %v489_v11, %v488_v10 }
 0x1ec   :  { %v492_v15 = vadd.f32 %v491_v13, %v490_v12 }
 0x1ee   :  { %v493_v16 = vrot.slane %v492_v15, 4 }
 0x1f0   :  { %v494_v18 = vadd.f32 %v493_v16, %v492_v15 }
 0x1f2   :  { %v495_v19 = vrot.slane %v494_v18, 2 }
 0x1f4   :  { %v496_v21 = vadd.f32 %v495_v19, %v494_v18 }
 0x1f6   :  { %v497_v23 = vrot.slane %v496_v21, 1 }
 0x1f8   :  { %v498_v25 = vadd.f32 %v497_v23, %v496_v21 }
 0x1fa   :  { %v509_v26 = vadd.f32 %v508_v24, %v498_v25 }
 0x1fc   :  { %511 = vst.msk [vmem:[#allocation3] sm:$0x1] %vm510_vm3, %v509_v26 }
 0x1fd   :  { %681 = shalt.err (!%p678_p4)
}
 0x1fe   :  { %s682_s4 = scalar_lea.hbm %s905_s7, 16 }
 0x1ff   :  { %p683_p5 = scmp.ne.s32.totalorder %s905_s7, %s682_s4  ;;  %p686_p6 = scmp.lt.u32.totalorder %s682_s4, %s905_s7 }
 0x201   :  { %p688_p7 = pnand %p686_p6, %p683_p5 }
 0x203   :  { %691 = shalt.err (!%p688_p7)
}
 0x204   :  { %521 = dma.vmem_to_hbm [thread:$0]  %s519_s27, 16, %s905_s7, [#allocation4]  }
 0x205   :  { %692 = dma.done.wait [#allocation4], 16  }
 0x206   :  { %693 = vsyncadd [#allocation4], 4294967280 }
 0x207   :  { %525 = vsyncpa [#allocation4], 1 }

</bundles_post_ra>
